<compile_context>
chip_gen: v5e
topology: v5e:2x2
jax: 0.10.0
libtpu: 0.0.40
codegen_flags: <defaults>
</compile_context>

<pallas_src>
import functools

import jax
import jax.numpy as jnp
import numpy as np
from jax.experimental import pallas as pl
from jax.experimental.pallas import tpu as pltpu


def _round_up(x: int, m: int) -> int:
    return ((x + m - 1) // m) * m


def _critic_kernel(x_ref, w1_ref, b1_ref, w2_ref, b2_ref, w3_ref, b3_ref, o_ref):
    """One (TB, S) batch tile through the full MLP.

    Dtypes are decided at the pallas_call boundary (no per-step casts here
    except where the dtype actually changes):
      x / w1 / w2   : matmul-input dtype (f32, or bf16 for the MXU fast path)
      b1 / b2       : epilogue dtype (f32 always on v5e; bf16 OK on v6e/v7x)
      w3 / b3 / out : f32 (value-head reduce and bias in f32)
    """
    # Layer 1: Linear (MXU, f32 accumulation) + bias + tanh (VPU/EUP).
    a1 = jnp.dot(x_ref[...], w1_ref[...], preferred_element_type=jnp.float32)
    h1 = jnp.tanh(a1.astype(b1_ref.dtype) + b1_ref[...])

    # Layer 2: Linear + bias + tanh.
    a2 = jnp.dot(h1.astype(w2_ref.dtype), w2_ref[...],
                 preferred_element_type=jnp.float32)
    h2 = jnp.tanh(a2.astype(b2_ref.dtype) + b2_ref[...])

    # Layer 3: value head (out_features == 1).  A 1-column MXU matmul wastes
    # the MXU; do it as a VPU multiply + XLU lane reduction in f32.
    v = jnp.sum(h2.astype(jnp.float32) * w3_ref[...], axis=-1, keepdims=True)

    # TODO(synk): lane-dense (1, TB) output block (sublane->lane relayout in
    # kernel) would replace the masked (TB,1) vst's; kept (TB,1) for guaranteed
    # lowering since output bytes are only 1/state_dim of the input stream.
    o_ref[...] = (v + b3_ref[0, 0]).astype(o_ref.dtype)


def _vmem_limit_bytes(tb, S, H, mm_dtype, ep_dtype, x_buffers):
    """Generous VMEM upper bound -> scoped-VMEM limit (v5e default 16 MiB,
    v6e/v7x default 32 MiB; v7x physical is only 64 MiB)."""
    lane, sub = 128, 8
    mm_b = jnp.dtype(mm_dtype).itemsize
    ep_b = jnp.dtype(ep_dtype).itemsize
    Sp = _round_up(S, lane)
    Hp = _round_up(H, lane)
    est = 0
    est += max(2, x_buffers) * tb * Sp * mm_b            # streamed x tiles
    est += 2 * Sp * Hp * mm_b + 2 * Hp * Hp * mm_b       # w1, w2 (double-buffered)
    est += 2 * 2 * sub * Hp * ep_b + 2 * sub * Hp * 4    # b1, b2, w3 row
    est += 2 * tb * lane * 4                             # (tb, 1) output blocks
    est += 4 * tb * Hp * 4                               # activations / temporaries
    return int(min(100 * 2**20, max(32 * 2**20, 2 * est)))


@functools.partial(
    jax.jit,
    static_argnames=("block_b", "use_bf16", "bf16_epilogue", "x_buffers"))
def ppo_critic_forward(state, w1, b1, w2, b2, w3, b3, *,
                       block_b: int = 1024,
                       use_bf16: bool = False,
                       bf16_epilogue: bool = False,
                       x_buffers: int = 2):
    """PPOCritic.forward: state (B, state_dim) -> value (B, 1) float32."""
    B, S = state.shape
    H = w1.shape[1]

    mm_dtype = jnp.bfloat16 if use_bf16 else jnp.float32
    ep_dtype = jnp.bfloat16 if (use_bf16 and bf16_epilogue) else jnp.float32

    # Boundary casts (one-time for the weights; no-ops if already that dtype).
    x = state if state.dtype == mm_dtype else state.astype(mm_dtype)
    w1c = w1.astype(mm_dtype)
    w2c = w2.astype(mm_dtype)
    b1c = b1.reshape(1, H).astype(ep_dtype)
    b2c = b2.reshape(1, H).astype(ep_dtype)
    w3_row = w3.reshape(1, H).astype(jnp.float32)   # row form for the VPU head
    b3_s = b3.reshape(1, 1).astype(jnp.float32)     # scalar -> SMEM

    # Batch tile: large enough to amortize the ~0.35us per-grid-step overhead,
    # but at least 2 grid steps when possible so the "parallel" batch axis can
    # shard across both v7x TensorCores.  Sublane alignment: 8 (f32) / 16 (bf16).
    row_align = 16 if mm_dtype == jnp.bfloat16 else 8
    if B <= row_align:
        tb = B                                   # single full block (== dim is legal)
    else:
        half = _round_up(pl.cdiv(B, 2), row_align)
        tb = max(row_align, min(_round_up(int(block_b), row_align), half))
    grid = (pl.cdiv(B, tb),)                     # partial trailing block, no pad

    # Streamed x spec; pipeline depth is a sweep knob (review: Buffered(3)
    # typically buys a few % when the per-step compute is short).
    if x_buffers == 2:
        x_spec = pl.BlockSpec((tb, S), lambda i: (i, 0))
    else:
        x_spec = pl.BlockSpec((tb, S), lambda i: (i, 0),
                              pipeline_mode=pl.Buffered(x_buffers))

    out = pl.pallas_call(
        _critic_kernel,
        out_shape=jax.ShapeDtypeStruct((B, 1), jnp.float32),
        grid=grid,
        in_specs=[
            x_spec,
            # Weights / biases: constant block index -> DMA'd once, VMEM-resident.
            pl.BlockSpec((S, H), lambda i: (0, 0)),
            pl.BlockSpec((1, H), lambda i: (0, 0)),
            pl.BlockSpec((H, H), lambda i: (0, 0)),
            pl.BlockSpec((1, H), lambda i: (0, 0)),
            pl.BlockSpec((1, H), lambda i: (0, 0)),
            # Scalar output bias lives in SMEM.
            pl.BlockSpec(memory_space=pltpu.MemorySpace.SMEM),
        ],
        out_specs=pl.BlockSpec((tb, 1), lambda i: (i, 0)),
        compiler_params=pltpu.CompilerParams(
            dimension_semantics=("parallel",),
            vmem_limit_bytes=_vmem_limit_bytes(tb, S, H, mm_dtype, ep_dtype,
                                               x_buffers),
        ),
    )(x, w1c, b1c, w2c, b2c, w3_row, b3_s)
    return out


# ----------------------------------------------------------------------------
# Parameter construction matching orthogonal_init (gain=sqrt(2), bias=0).
# ----------------------------------------------------------------------------
def _orthogonal(key, shape, gain):
    init = jax.nn.initializers.orthogonal(scale=gain)
    return init(key, shape, jnp.float32)


def make_params(key, state_dim, hidden_size):
    gain = float(np.sqrt(2.0))
    k1, k2, k3 = jax.random.split(key, 3)
    # Stored as (in, out); orthogonality is preserved under transpose, so this
    # matches nn.init.orthogonal_ on PyTorch's (out, in) weight (distributionally).
    w1 = _orthogonal(k1, (state_dim, hidden_size), gain)
    b1 = jnp.zeros((1, hidden_size), jnp.float32)
    w2 = _orthogonal(k2, (hidden_size, hidden_size), gain)
    b2 = jnp.zeros((1, hidden_size), jnp.float32)
    w3 = _orthogonal(k3, (hidden_size, 1), gain)
    b3 = jnp.zeros((1, 1), jnp.float32)
    return w1, b1, w2, b2, w3, b3


def _reference(state, w1, b1, w2, b2, w3, b3):
    h = jnp.tanh(state @ w1 + b1)
    h = jnp.tanh(h @ w2 + b2)
    return h @ w3 + b3


if __name__ == "__main__":
    key = jax.random.PRNGKey(0)
    k_state, k_state2, k_params = jax.random.split(key, 3)

    # hidden_size kept a multiple of 128 (lane-dense activations, per review).
    batch, state_dim, hidden_size = 64, 16, 128

    state = jax.random.normal(k_state, (batch, state_dim), jnp.float32)
    params = make_params(k_params, state_dim, hidden_size)
    ref = _reference(state, *params)

    # 1) Default f32 path: batch split into 2 tiles of 32 (both v7x TCs busy).
    out = jax.block_until_ready(ppo_critic_forward(state, *params))
    assert out.shape == (batch, 1)
    np.testing.assert_allclose(np.asarray(out), np.asarray(ref),
                               rtol=1e-5, atol=1e-5)

    # 2) Small tiles -> longer pipelined grid (4 steps of 16 rows).
    out_tiled = jax.block_until_ready(
        ppo_critic_forward(state, *params, block_b=16))
    np.testing.assert_allclose(np.asarray(out_tiled), np.asarray(ref),
                               rtol=1e-5, atol=1e-5)

    # 3) Batch not divisible by the tile: partial trailing block, no jnp.pad.
    b_odd = 50
    state_odd = jax.random.normal(k_state2, (b_odd, state_dim), jnp.float32)
    ref_odd = _reference(state_odd, *params)
    out_odd = jax.block_until_ready(ppo_critic_forward(state_odd, *params))
    assert out_odd.shape == (b_odd, 1)
    np.testing.assert_allclose(np.asarray(out_odd), np.asarray(ref_odd),
                               rtol=1e-5, atol=1e-5)

    # 4) bf16 MXU fast path (boundary casts), f32 epilogue (v5e-safe).
    out_bf16 = jax.block_until_ready(
        ppo_critic_forward(state, *params, use_bf16=True))
    np.testing.assert_allclose(np.asarray(out_bf16), np.asarray(ref),
                               rtol=5e-2, atol=5e-2)

    # 5) bf16 epilogue (bias + tanh in bf16) — the v6e/v7x fast path.
    out_bf16e = jax.block_until_ready(
        ppo_critic_forward(state, *params, use_bf16=True, bf16_epilogue=True))
    np.testing.assert_allclose(np.asarray(out_bf16e), np.asarray(ref),
                               rtol=7e-2, atol=7e-2)

    print("KERNEL_OK")
</pallas_src>

<mosaic_0001>
module attributes {stable_mosaic.version = 11 : i64} {
  func.func @_critic_kernel(%arg0: i32, %arg1: memref<32x16xf32, #tpu.memory_space<vmem>>, %arg2: memref<16x128xf32, #tpu.memory_space<vmem>>, %arg3: memref<1x128xf32, #tpu.memory_space<vmem>>, %arg4: memref<128x128xf32, #tpu.memory_space<vmem>>, %arg5: memref<1x128xf32, #tpu.memory_space<vmem>>, %arg6: memref<1x128xf32, #tpu.memory_space<vmem>>, %arg7: memref<1x1xf32, #tpu.memory_space<smem>>, %arg8: memref<32x1xf32, #tpu.memory_space<vmem>>) attributes {dimension_semantics = [#tpu.dimension_semantics<parallel>], iteration_bounds = array<i64: 2>, scalar_prefetch = 0 : i64, scratch_operands = 0 : i64, tpu.core_type = #tpu.core_type<tc>, window_params = [{transform_indices = @transform_0, window_bounds = array<i64: 32, 16>}, {pipeline_mode = #tpu.pipeline_mode<synchronous>, transform_indices = @transform_1, window_bounds = array<i64: 16, 128>}, {pipeline_mode = #tpu.pipeline_mode<synchronous>, transform_indices = @transform_2, window_bounds = array<i64: 1, 128>}, {pipeline_mode = #tpu.pipeline_mode<synchronous>, transform_indices = @transform_3, window_bounds = array<i64: 128, 128>}, {pipeline_mode = #tpu.pipeline_mode<synchronous>, transform_indices = @transform_4, window_bounds = array<i64: 1, 128>}, {pipeline_mode = #tpu.pipeline_mode<synchronous>, transform_indices = @transform_5, window_bounds = array<i64: 1, 128>}, {transform_indices = @transform_6, window_bounds = array<i64: 1, 1>}, {transform_indices = @transform_7, window_bounds = array<i64: 32, 1>}]} {
    %c0 = arith.constant 0 : index
    %c0_0 = arith.constant 0 : index
    %0 = vector.load %arg1[%c0, %c0_0] : memref<32x16xf32, #tpu.memory_space<vmem>>, vector<32x16xf32>
    %c0_1 = arith.constant 0 : index
    %c0_2 = arith.constant 0 : index
    %1 = vector.load %arg2[%c0_1, %c0_2] : memref<16x128xf32, #tpu.memory_space<vmem>>, vector<16x128xf32>
    %cst = arith.constant dense<0.000000e+00> : vector<32x128xf32>
    %2 = tpu.matmul %0, %1, %cst {dimension_numbers = #tpu.dot_dimension_numbers<[1], [0], [0], [1], [0, 0, 1, 1], [], []>} : vector<32x16xf32>, vector<16x128xf32>, vector<32x128xf32> -> vector<32x128xf32>
    %c0_3 = arith.constant 0 : index
    %c0_4 = arith.constant 0 : index
    %3 = vector.load %arg3[%c0_3, %c0_4] : memref<1x128xf32, #tpu.memory_space<vmem>>, vector<1x128xf32>
    %4 = vector.broadcast %3 : vector<1x128xf32> to vector<32x128xf32>
    %5 = arith.addf %2, %4 : vector<32x128xf32>
    %6 = math.tanh %5 : vector<32x128xf32>
    %c0_5 = arith.constant 0 : index
    %c0_6 = arith.constant 0 : index
    %7 = vector.load %arg4[%c0_5, %c0_6] : memref<128x128xf32, #tpu.memory_space<vmem>>, vector<128x128xf32>
    %cst_7 = arith.constant dense<0.000000e+00> : vector<32x128xf32>
    %8 = tpu.matmul %6, %7, %cst_7 {dimension_numbers = #tpu.dot_dimension_numbers<[1], [0], [0], [1], [0, 0, 1, 1], [], []>} : vector<32x128xf32>, vector<128x128xf32>, vector<32x128xf32> -> vector<32x128xf32>
    %c0_8 = arith.constant 0 : index
    %c0_9 = arith.constant 0 : index
    %9 = vector.load %arg5[%c0_8, %c0_9] : memref<1x128xf32, #tpu.memory_space<vmem>>, vector<1x128xf32>
    %10 = vector.broadcast %9 : vector<1x128xf32> to vector<32x128xf32>
    %11 = arith.addf %8, %10 : vector<32x128xf32>
    %12 = math.tanh %11 : vector<32x128xf32>
    %c0_10 = arith.constant 0 : index
    %c0_11 = arith.constant 0 : index
    %13 = vector.load %arg6[%c0_10, %c0_11] : memref<1x128xf32, #tpu.memory_space<vmem>>, vector<1x128xf32>
    %14 = vector.broadcast %13 : vector<1x128xf32> to vector<32x128xf32>
    %15 = arith.mulf %12, %14 : vector<32x128xf32>
    %cst_12 = arith.constant dense<0.000000e+00> : vector<32xf32>
    %16 = vector.multi_reduction <add>, %15, %cst_12 [1] : vector<32x128xf32> to vector<32xf32>
    %17 = vector.shape_cast %16 : vector<32xf32> to vector<32x1xf32>
    %c0_13 = arith.constant 0 : index
    %c0_14 = arith.constant 0 : index
    %18 = memref.load %arg7[%c0_13, %c0_14] : memref<1x1xf32, #tpu.memory_space<smem>>
    %19 = vector.broadcast %18 : f32 to vector<32x1xf32>
    %20 = arith.addf %17, %19 : vector<32x1xf32>
    %c0_15 = arith.constant 0 : index
    %c0_16 = arith.constant 0 : index
    %21 = vector.load %arg8[%c0_15, %c0_16] : memref<32x1xf32, #tpu.memory_space<vmem>>, vector<32x1xf32>
    tpu.vector_store %arg8[%c0_15, %c0_16], %20 {strides = array<i32>} : memref<32x1xf32, #tpu.memory_space<vmem>>, vector<32x1xf32>,
    return
  }
  func.func @transform_0(%arg0: i32) -> (i32, i32) {
    %c0_i32 = arith.constant 0 : i32
    %c0_i32_0 = arith.constant 0 : i32
    return %arg0, %c0_i32 : i32, i32
  }
  func.func @transform_1(%arg0: i32) -> (i32, i32) {
    %c0_i32 = arith.constant 0 : i32
    %c0_i32_0 = arith.constant 0 : i32
    %c0_i32_1 = arith.constant 0 : i32
    return %c0_i32, %c0_i32_0 : i32, i32
  }
  func.func @transform_2(%arg0: i32) -> (i32, i32) {
    %c0_i32 = arith.constant 0 : i32
    %c0_i32_0 = arith.constant 0 : i32
    %c0_i32_1 = arith.constant 0 : i32
    return %c0_i32, %c0_i32_0 : i32, i32
  }
  func.func @transform_3(%arg0: i32) -> (i32, i32) {
    %c0_i32 = arith.constant 0 : i32
    %c0_i32_0 = arith.constant 0 : i32
    %c0_i32_1 = arith.constant 0 : i32
    return %c0_i32, %c0_i32_0 : i32, i32
  }
  func.func @transform_4(%arg0: i32) -> (i32, i32) {
    %c0_i32 = arith.constant 0 : i32
    %c0_i32_0 = arith.constant 0 : i32
    %c0_i32_1 = arith.constant 0 : i32
    return %c0_i32, %c0_i32_0 : i32, i32
  }
  func.func @transform_5(%arg0: i32) -> (i32, i32) {
    %c0_i32 = arith.constant 0 : i32
    %c0_i32_0 = arith.constant 0 : i32
    %c0_i32_1 = arith.constant 0 : i32
    return %c0_i32, %c0_i32_0 : i32, i32
  }
  func.func @transform_6(%arg0: i32) -> (i32, i32) {
    %c0_i32 = arith.constant 0 : i32
    %c0_i32_0 = arith.constant 0 : i32
    %c0_i32_1 = arith.constant 0 : i32
    return %c0_i32, %c0_i32_0 : i32, i32
  }
  func.func @transform_7(%arg0: i32) -> (i32, i32) {
    %c0_i32 = arith.constant 0 : i32
    %c0_i32_0 = arith.constant 0 : i32
    return %arg0, %c0_i32 : i32, i32
  }
}

</mosaic_0001>

<bundles_post_ra>
// kernel: ppo_critic_forward.1
= control target key start
LH: loop header
LB: loop body
LE: loop exit
PB: predicated region body
PF: predicated region fallthrough
CT: control target
= control target key end

     0   :  { %s749_s0 = inlined_call_operand.vmem [shape: f32[64,16], index: 0, kind: input, shape index: {}]   ;;  %s750_s1 = inlined_call_operand.vmem [shape: f32[16,128], index: 1, kind: input, shape index: {}]   ;;  %s751_s2 = inlined_call_operand.vmem [shape: f32[1,128], index: 2, kind: input, shape index: {}]   ;;  %s752_s3 = inlined_call_operand.hbm [shape: f32[128,128], index: 3, kind: input, shape index: {}]   ;;  %s753_s4 = inlined_call_operand.vmem [shape: f32[1,128], index: 4, kind: input, shape index: {}]   ;;  %s754_s5 = inlined_call_operand.vmem [shape: f32[1,128], index: 5, kind: input, shape index: {}]   ;;  %s755_s6 = inlined_call_operand.<no memory space> [shape: f32[1,1], index: 6, kind: input, shape index: {}]   ;;  %s756_s7 = inlined_call_operand.vmem [shape: f32[64,1], index: 7, kind: output, shape index: {}]  }
   0x1   :  { %12 = sst [smem:[#allocation2]] %s755_s6 }
   0x2   :  { %13 = vsyncpa [#allocation4], 0  ;;  %s697_s26 = smov 0  }
   0x3 LB: > { %s219_s29 = sshll.u32 %s752_s3, 4  ;;  %s504_s30 = sadd.s32 4294967295, %s649_s26   ;;  %s649_s26 = sphi %s697_s26, %s19_s26   ;;  %s220_s29 = int_to_ptr.hbm [resolvable:$true] %s219_s29 }
   0x4   : > { %p506_p0 = scmp.ge.s32.totalorder %s649_s26, 1  ;;  %p202_p1 = scmp.lt.s32.totalorder %s649_s26, 3 }
   0x5   : > { %p577_p2 = scmp.eq.s32.totalorder %s504_s30, 0  ;;  %s651_s6 = smov [#allocation3]  }
   0x6   : > { %p203_p3 = pnand %p506_p0, %p202_p1  ;;  %s221_s8 = sshll.u32 %s651_s6, 4  ;;  %s222_s8 = int_to_ptr.vmem [resolvable:$true] %s221_s8 }
   0x7   : > { %s652_s9 = smov 128   ;;  %s653_s10 = smov 8  }
   0x8   : > { %p573_p4 = pneg %p203_p3  ;;  %255 = sbr.rel (%p203_p3) target bundleno = 442 (0x1ba), region = 48 }
   0xa   : > { %p574_p5 = pnand %p577_p2, %p573_p4 }
   0xc   : > { %576 = dma.hbm_to_vmem [thread:$0]  (!%p574_p5), %s220_s29, 2048, %s222_s8, [#allocation4], %s652_s9, %s652_s9, %s653_s10  }
   0xd   : > { %644 = dma.done.wait (%p577_p2), [#allocation4], 2048  }
   0xe   : > { %646 = vsyncadd (%p577_p2), [#allocation4], 4294965248  ;;  %s511_s11 = sshll.u32 %s504_s30, 2  ;;  %v305_v0 = vld [vmem:[%s750_s1 + $0x8] sm:$0xff]  ;;  %v304_v1 = vld [vmem:[%s750_s1] sm:$0xff]  ;;  %vm310_vm0 = vcmask 130048  }
   0xf   : > { %p289_p6 = scmp.lt.s32.totalorder %s511_s11, 7  ;;  %337 = vmatpush.msra.mxu0 %v305_v0  ;;  %v371_v3 = vld [vmem:[#allocation3 + $0x78] sm:$0xff]  ;;  %v370_v4 = vld [vmem:[#allocation3 + $0x70] sm:$0xff]  ;;  %v369_v5 = vld [vmem:[#allocation3 + $0x68] sm:$0xff]  ;;  %s425_s27 = sld [smem:[#allocation2]]  ;;  %vm431_vm1 = vcmask 7168  }
  0x10   : > { %521 = vmatpush.msra.mxu1 %v371_v3  ;;  %522 = vmatpush.msra.mxu2 %v371_v3  ;;  %v368_v6 = vld [vmem:[#allocation3 + $0x60] sm:$0xff]  ;;  %v367_v8 = vld [vmem:[#allocation3 + $0x58] sm:$0xff]  ;;  %v366_v9 = vld [vmem:[#allocation3 + $0x50] sm:$0xff] }
  0x11   : > { %s758_s11 = smov (!%p289_p6, %s511_s11), 7  ;;  %338 = vmatpush.msra.mxu0 %v304_v1  ;;  %523 = vmatpush.msra.mxu3 %v371_v3  ;;  %v365_v10 = vld [vmem:[#allocation3 + $0x48] sm:$0xff]  ;;  %v364_v11 = vld [vmem:[#allocation3 + $0x40] sm:$0xff]  ;;  %v363_v13 = vld [vmem:[#allocation3 + $0x38] sm:$0xff] }
  0x12   : > { %s512_s12 = sshll.u32 %s758_s11, 3  ;;  %524 = vmatpush.msra.mxu1 %v370_v4  ;;  %525 = vmatpush.msra.mxu2 %v370_v4  ;;  %v362_v14 = vld [vmem:[#allocation3 + $0x30] sm:$0xff]  ;;  %v361_v15 = vld [vmem:[#allocation3 + $0x28] sm:$0xff]  ;;  %v360_v17 = vld [vmem:[#allocation3 + $0x20] sm:$0xff] }
  0x13   : > { %s716_s15 = scalar_lea.vmem %s749_s0, %s512_s12  ;;  %376 = vmatpush.msrb.mxu0 %v371_v3  ;;  %526 = vmatpush.msra.mxu3 %v370_v4  ;;  %v359_v18 = vld [vmem:[#allocation3 + $0x18] sm:$0xff]  ;;  %v358_v19 = vld [vmem:[#allocation3 + $0x10] sm:$0xff]  ;;  %v357_v20 = vld [vmem:[#allocation3 + $0x8] sm:$0xff]  ;;  %s298_s30 = scalar_lea.vmem %s756_s7, %s512_s12 }
  0x14   : > { %v300_v2 = vld [vmem:[%s716_s15] sm:$0xff]  ;;  %527 = vmatpush.msra.mxu1 %v369_v5  ;;  %528 = vmatpush.msra.mxu2 %v369_v5  ;;  %v301_v7 = vld [vmem:[%s716_s15 + $0x8] sm:$0xff]  ;;  %v302_v12 = vld [vmem:[%s716_s15 + $0x10] sm:$0xff] }
  0x15   : > { %515 = vmatmul.msk.f32.vlgmr.msra.gmra.mxu0 %vm310_vm0, %v300_v2  ;;  %529 = vmatpush.msra.mxu3 %v369_v5  ;;  %v303_v16 = vld [vmem:[%s716_s15 + $0x18] sm:$0xff]  ;;  %v356_v21 = vld [vmem:[#allocation3] sm:$0xff]  ;;  %v426_v53 = vstv %s425_s27 }
  0x16   : > { %377 = vmatpush.msrb.mxu0 %v370_v4  ;;  %530 = vmatpush.msra.mxu1 %v368_v6  ;;  %v590_v22 = vld [vmem:[%s751_s2] ss:$0 sm:$0xff] }
  0x17   : > { %531 = vmatpush.msra.mxu2 %v368_v6  ;;  %532 = vmatpush.msra.mxu3 %v368_v6  ;;  %v591_v35 = vld [vmem:[%s753_s4] ss:$0 sm:$0xff] }
  0x18   : > { %378 = vmatpush.msrb.mxu0 %v369_v5  ;;  %533 = vmatpush.msra.mxu1 %v367_v8  ;;  %v592_v38 = vld [vmem:[%s754_s5] ss:$0 sm:$0xff] }
  0x19   : > { %534 = vmatpush.msra.mxu2 %v367_v8  ;;  %535 = vmatpush.msra.mxu3 %v367_v8 }
  0x1a   : > { %379 = vmatpush.msrb.mxu0 %v368_v6  ;;  %536 = vmatpush.msra.mxu1 %v366_v9 }
  0x1b   : > { %537 = vmatpush.msra.mxu2 %v366_v9  ;;  %538 = vmatpush.msra.mxu3 %v366_v9 }
  0x1c   : > { %380 = vmatpush.msrb.mxu0 %v367_v8  ;;  %539 = vmatpush.msra.mxu1 %v365_v10 }
  0x1d   : > { %516 = vmatmul.msk.f32.gmra.mxu0 %vm310_vm0, %v301_v7  ;;  %540 = vmatpush.msra.mxu2 %v365_v10 }
  0x1e   : > { %381 = vmatpush.msrb.mxu0 %v366_v9  ;;  %542 = vmatpush.msra.mxu1 %v364_v11 }
  0x1f   : > { %543 = vmatpush.msra.mxu2 %v364_v11  ;;  %541 = vmatpush.msra.mxu3 %v365_v10 }
  0x20   : > { %382 = vmatpush.msrb.mxu0 %v365_v10  ;;  %545 = vmatpush.msra.mxu1 %v363_v13 }
  0x21   : > { %546 = vmatpush.msra.mxu2 %v363_v13  ;;  %544 = vmatpush.msra.mxu3 %v364_v11 }
  0x22   : > { %383 = vmatpush.msrb.mxu0 %v364_v11  ;;  %548 = vmatpush.msra.mxu1 %v362_v14 }
  0x23   : > { %549 = vmatpush.msra.mxu2 %v362_v14  ;;  %547 = vmatpush.msra.mxu3 %v363_v13 }
  0x24   : > { %384 = vmatpush.msrb.mxu0 %v363_v13  ;;  %551 = vmatpush.msra.mxu1 %v361_v15 }
  0x25   : > { %517 = vmatmul.msk.f32.gmra.mxu0 %vm310_vm0, %v302_v12  ;;  %552 = vmatpush.msra.mxu2 %v361_v15 }
  0x26   : > { %385 = vmatpush.msrb.mxu0 %v362_v14  ;;  %550 = vmatpush.msra.mxu3 %v362_v14 }
  0x27   : > { %554 = vmatpush.msra.mxu1 %v360_v17  ;;  %555 = vmatpush.msra.mxu2 %v360_v17 }
  0x28   : > { %386 = vmatpush.msrb.mxu0 %v361_v15  ;;  %553 = vmatpush.msra.mxu3 %v361_v15 }
  0x29   : > { %557 = vmatpush.msra.mxu1 %v359_v18  ;;  %558 = vmatpush.msra.mxu2 %v359_v18 }
  0x2a   : > { %387 = vmatpush.msrb.mxu0 %v360_v17  ;;  %556 = vmatpush.msra.mxu3 %v360_v17 }
  0x2b   : > { %560 = vmatpush.msra.mxu1 %v358_v19  ;;  %561 = vmatpush.msra.mxu2 %v358_v19 }
  0x2c   : > { %388 = vmatpush.msrb.mxu0 %v359_v18  ;;  %559 = vmatpush.msra.mxu3 %v359_v18 }
  0x2d   : > { %518 = vmatmul.msk.f32.gmra.mxu0 %vm310_vm0, %v303_v16  ;;  %563 = vmatpush.msra.mxu1 %v357_v20 }
  0x2e   : > { %389 = vmatpush.msrb.mxu0 %v358_v19  ;;  %562 = vmatpush.msra.mxu3 %v358_v19 }
  0x2f   : > { %564 = vmatpush.msra.mxu2 %v357_v20  ;;  %566 = vmatpush.msra.mxu1 %v356_v21 }
  0x30   : > { %390 = vmatpush.msrb.mxu0 %v357_v20  ;;  %565 = vmatpush.msra.mxu3 %v357_v20 }
  0x31   : > { %567 = vmatpush.msra.mxu2 %v356_v21 }
  0x32   : > { %391 = vmatpush.msrb.mxu0 %v356_v21  ;;  %568 = vmatpush.msra.mxu3 %v356_v21 }
  0x92   : > { %v340_v23 = vpop.f32.mrf.mxu0 }
  0x93   : > { %v341_v24 = vadd.f32 %v590_v22, %v340_v23 }
  0x95   : > { %593 = vtanh.f32 %v341_v24 }
  0x9a   : > { %v343_v25 = vpop.f32.mrf.mxu0 }
  0x9b   : > { %v594_v26 = vpop.eup %593  ;;  %v344_v27 = vadd.f32 %v590_v22, %v343_v25 }
  0x9c   : > { %392 = vmatmul.f32.vlgmr.msrb.gmra.mxu0 %v594_v26 }
  0x9d   : > { %595 = vtanh.f32 %v344_v27 }
  0xa2   : > { %v346_v28 = vpop.f32.mrf.mxu0 }
  0xa3   : > { %v596_v29 = vpop.eup %595  ;;  %v347_v30 = vadd.f32 %v590_v22, %v346_v28 }
  0xa4   : > { %395 = vmatmul.f32.vlgmr.msra.gmra.mxu1 %v596_v29 }
  0xa5   : > { %597 = vtanh.f32 %v347_v30 }
  0xaa   : > { %v349_v31 = vpop.f32.mrf.mxu0 }
  0xab   : > { %v598_v32 = vpop.eup %597  ;;  %v350_v33 = vadd.f32 %v590_v22, %v349_v31 }
  0xac   : > { %398 = vmatmul.f32.vlgmr.msra.gmra.mxu2 %v598_v32 }
  0xad   : > { %599 = vtanh.f32 %v350_v33 }
  0xb3   : > { %v600_v34 = vpop.eup %599 }
  0xb4   : > { %401 = vmatmul.f32.vlgmr.msra.gmra.mxu3 %v600_v34 }
 0x119   : > { %v393_v36 = vpop.f32.mrf.mxu0 }
 0x11a   : > { %v394_v37 = vadd.f32 %v591_v35, %v393_v36 }
 0x11c   : > { %601 = vtanh.f32 %v394_v37 }
 0x121   : > { %v396_v39 = vpop.f32.mrf.mxu1 }
 0x122   : > { %v602_v40 = vpop.eup %601  ;;  %v397_v41 = vadd.f32 %v591_v35, %v396_v39 }
 0x123   : > { %v413_v42 = vmul.f32 %v602_v40, %v592_v38 }
 0x124   : > { %603 = vtanh.f32 %v397_v41 }
 0x125   : > { %417 = vadd.xlane.f32.xlu0 %v413_v42 }
 0x12a   : > { %v604_v43 = vpop.eup %603 }
 0x12b   : > { %v414_v44 = vmul.f32 %v604_v43, %v592_v38 }
 0x12d   : > { %419 = vadd.xlane.f32.xlu0 %v414_v44 }
 0x12f   : > { %v399_v45 = vpop.f32.mrf.mxu2 }
 0x130   : > { %v400_v46 = vadd.f32 %v591_v35, %v399_v45 }
 0x132   : > { %605 = vtanh.f32 %v400_v46 }
 0x137   : > { %v402_v47 = vpop.f32.mrf.mxu3 }
 0x138   : > { %v606_v48 = vpop.eup %605  ;;  %v403_v49 = vadd.f32 %v591_v35, %v402_v47 }
 0x139   : > { %v415_v50 = vmul.f32 %v606_v48, %v592_v38 }
 0x13a   : > { %607 = vtanh.f32 %v403_v49 }
 0x13b   : > { %421 = vadd.xlane.f32.xlu1 %v415_v50 }
 0x140   : > { %v608_v51 = vpop.eup %607 }
 0x141   : > { %v416_v52 = vmul.f32 %v608_v51, %v592_v38 }
 0x143   : > { %423 = vadd.xlane.f32.xlu1 %v416_v52 }
 0x198   : > { %v418_v54 = vpop.xlane.xlu0 %417 }
 0x199   : > { %v427_v55 = vadd.f32 %v426_v53, %v418_v54 }
 0x19b   : > { %432 = vst.msk [vmem:[%s298_s30] sm:$0xff] %vm431_vm1, %v427_v55 }
 0x1a0   : > { %v420_v56 = vpop.xlane.xlu0 %419 }
 0x1a1   : > { %v428_v57 = vadd.f32 %v426_v53, %v420_v56 }
 0x1a3   : > { %433 = vst.msk [vmem:[%s298_s30 + $0x8] sm:$0xff] %vm431_vm1, %v428_v57 }
 0x1ae   : > { %v422_v58 = vpop.xlane.xlu1 %421 }
 0x1af   : > { %v429_v59 = vadd.f32 %v426_v53, %v422_v58 }
 0x1b1   : > { %434 = vst.msk [vmem:[%s298_s30 + $0x10] sm:$0xff] %vm431_vm1, %v429_v59 }
 0x1b6   : > { %v424_v60 = vpop.xlane.xlu1 %423 }
 0x1b7   : > { %v430_v61 = vadd.f32 %v426_v53, %v424_v60 }
 0x1b9   : > { %435 = vst.msk [vmem:[%s298_s30 + $0x18] sm:$0xff] %vm431_vm1, %v430_v61 }
 0x1ba PF: > { %s19_s26 = sadd.s32 1, %s649_s26  }
 0x1bb   : > { %p16_p7 = scmp.ge.s32.totalorder %s19_s26, 4  }
 0x1bd   :  { %18 = sbr.rel (!%p16_p7) target bundleno = 3 (0x3), region = 83 }
 0x1c2   :  { %458 = vsyncpa [#allocation4], 1 }
 0x1c3   :  { %460 = vsyncpa [#allocation4 + $0x1], 1 }

</bundles_post_ra>
